<compile_context>
chip_gen: v5e
topology: v5e:2x2
jax: 0.10.0
libtpu: 0.0.40
codegen_flags: <defaults>
</compile_context>

<pallas_src>
import functools

import jax
import jax.numpy as jnp
from jax.experimental import pallas as pl
from jax.experimental.pallas import tpu as pltpu


def autopad(k, d=1):
    # same as the reference `pad(k, d)` helper used by the module
    if d > 1:
        k = d * (k - 1) + 1
    return k // 2


def _round_up(x, m):
    return ((x + m - 1) // m) * m


# ----------------------------------------------------------------------------
# Pallas kernel: tiled GEMM with f32 accumulator, fused bias + activation
# ----------------------------------------------------------------------------
def _gemm_bn_act_kernel(p_ref, w_ref, bias_ref, o_ref, acc_ref, *, act):
    # p_ref    : (tm, tk)  bf16 im2col patches tile
    # w_ref    : (tk, tn)  bf16 conv weight tile (BN scale pre-folded)
    # bias_ref : (1, tn)   f32 folded BatchNorm bias
    # o_ref    : (tm, tn)  f32 output tile
    # acc_ref  : (tm, tn)  f32 accumulator scratch (resident across K axis)
    k = pl.program_id(2)

    @pl.when(k == 0)
    def _():
        acc_ref[...] = jnp.zeros_like(acc_ref)

    acc_ref[...] += jnp.dot(p_ref[...], w_ref[...],
                            preferred_element_type=jnp.float32)

    @pl.when(k == pl.num_programs(2) - 1)
    def _():
        y = acc_ref[...] + bias_ref[...]
        if act == "silu":
            y = y * jax.nn.sigmoid(y)
        o_ref[...] = y.astype(o_ref.dtype)


def _fused_matmul_bn_act(patches, w_mat, bias, act, tm, tn, tk):
    Mp, Kp = patches.shape
    _, C2p = w_mat.shape
    assert Mp % tm == 0 and Kp % tk == 0 and C2p % tn == 0

    grid = (Mp // tm, C2p // tn, Kp // tk)
    kernel = functools.partial(_gemm_bn_act_kernel, act=act)

    flops = 2 * Mp * Kp * C2p
    bytes_accessed = (patches.size * patches.dtype.itemsize
                      + w_mat.size * w_mat.dtype.itemsize
                      + bias.size * 4
                      + Mp * C2p * 4)

    return pl.pallas_call(
        kernel,
        out_shape=jax.ShapeDtypeStruct((Mp, C2p), jnp.float32),
        grid_spec=pltpu.PrefetchScalarGridSpec(
            num_scalar_prefetch=0,
            grid=grid,
            in_specs=[
                pl.BlockSpec((tm, tk), lambda i, j, k: (i, k)),
                pl.BlockSpec((tk, tn), lambda i, j, k: (k, j)),
                pl.BlockSpec((1, tn), lambda i, j, k: (0, j)),
            ],
            out_specs=pl.BlockSpec((tm, tn), lambda i, j, k: (i, j)),
            scratch_shapes=[pltpu.VMEM((tm, tn), jnp.float32)],
        ),
        compiler_params=pltpu.CompilerParams(
            dimension_semantics=("parallel", "parallel", "arbitrary"),
        ),
        cost_estimate=pl.CostEstimate(
            flops=flops,
            transcendentals=(Mp * C2p if act == "silu" else 0),
            bytes_accessed=bytes_accessed,
        ),
    )(patches, w_mat, bias)


# ----------------------------------------------------------------------------
# Plain-JAX glue: im2col (in bf16) + parameter folding
# ----------------------------------------------------------------------------
def _im2col(x, kh, kw, s, ph, pw, d):
    # x: (N, C1, H, W)  ->  (N*Ho*Wo, C1*kh*kw); row order matches the
    # PyTorch weight layout (C2, C1, kh, kw) flattened over (C1, kh, kw).
    # TODO(synk): fully fuse im2col into the Pallas kernel (shifted-window
    # index_map / manual DMA over the padded NHWC input) to avoid the
    # kh*kw-expanded patches round-trip through HBM entirely.
    N, C1, H, W = x.shape
    xp = jnp.pad(x, ((0, 0), (0, 0), (ph, ph), (pw, pw)))
    Ho = (H + 2 * ph - d * (kh - 1) - 1) // s + 1
    Wo = (W + 2 * pw - d * (kw - 1) - 1) // s + 1
    cols = []
    for i in range(kh):
        for j in range(kw):
            patch = xp[:, :,
                       i * d: i * d + (Ho - 1) * s + 1: s,
                       j * d: j * d + (Wo - 1) * s + 1: s]  # (N, C1, Ho, Wo)
            cols.append(patch)
    patches = jnp.stack(cols, axis=2)                       # (N, C1, kh*kw, Ho, Wo)
    patches = patches.reshape(N, C1 * kh * kw, Ho, Wo)
    patches = jnp.transpose(patches, (0, 2, 3, 1)).reshape(N * Ho * Wo, C1 * kh * kw)
    return patches, Ho, Wo


def conv2d_act(x, conv_w, bn_gamma, bn_beta, bn_mean, bn_var,
               *, stride=1, padding=None, dilation=1, eps=1e-3,
               act=None, tm=256, compute_dtype=jnp.bfloat16):
    """Forward of Conv2dAct. x: (N, C1, H, W) float32, returns (N, C2, Ho, Wo)."""
    C2, C1, kh, kw = conv_w.shape
    if padding is None:
        ph = autopad(kh, dilation)
        pw = autopad(kw, dilation)
    else:
        ph = pw = padding

    # Fold BatchNorm (eval mode) into per-output-channel scale/bias; fold the
    # scale directly into the weight matrix (removes a VPU multiply per tile).
    scale = bn_gamma / jnp.sqrt(bn_var + eps)                      # (C2,)
    bias = bn_beta - bn_mean * scale                               # (C2,)
    w_mat = conv_w.reshape(C2, C1 * kh * kw).T * scale[None, :]    # (K, C2) f32

    # im2col directly in the compute dtype (bf16) -> half the HBM bytes.
    patches, Ho, Wo = _im2col(x.astype(compute_dtype), kh, kw, stride, ph, pw,
                              dilation)

    N = x.shape[0]
    M = N * Ho * Wo
    K = C1 * kh * kw

    # ---- pad to lane/tile-friendly shapes ----------------------------------
    C2p = _round_up(C2, 128)                # lane-dense output stores
    tn = 256 if C2p % 256 == 0 else 128     # C2 tile (multiple of 128)
    if K <= 512:
        tk, Kp = K, K                       # single full-extent K block
    else:
        tk = 512
        Kp = _round_up(K, tk)
    tm = max(8, min(tm, _round_up(M, 8)))
    Mp = _round_up(M, tm)                   # pad rows instead of shrinking tm

    patches = jnp.pad(patches, ((0, Mp - M), (0, Kp - K))).astype(compute_dtype)
    w_mat = jnp.pad(w_mat, ((0, Kp - K), (0, C2p - C2))).astype(compute_dtype)
    bias_p = jnp.pad(bias, (0, C2p - C2)).reshape(1, C2p).astype(jnp.float32)

    out = _fused_matmul_bn_act(patches, w_mat, bias_p, act, tm, tn, tk)
    out = out[:M, :C2]                                   # drop row/channel pad
    # TODO(synk): the NHWC->NCHW transpose below is an extra HBM round-trip;
    # kept so the external interface matches the PyTorch module (NCHW).
    out = out.reshape(N, Ho, Wo, C2).transpose(0, 3, 1, 2)
    return out


# ----------------------------------------------------------------------------
# Pure-JAX reference for verification
# ----------------------------------------------------------------------------
def conv2d_act_ref(x, conv_w, bn_gamma, bn_beta, bn_mean, bn_var,
                   *, stride=1, padding=None, dilation=1, eps=1e-3, act=None):
    C2, C1, kh, kw = conv_w.shape
    if padding is None:
        ph = autopad(kh, dilation)
        pw = autopad(kw, dilation)
    else:
        ph = pw = padding
    y = jax.lax.conv_general_dilated(
        x, conv_w,
        window_strides=(stride, stride),
        padding=[(ph, ph), (pw, pw)],
        rhs_dilation=(dilation, dilation),
        dimension_numbers=("NCHW", "OIHW", "NCHW"))
    scale = (bn_gamma / jnp.sqrt(bn_var + eps)).reshape(1, C2, 1, 1)
    bias = (bn_beta - bn_mean * bn_gamma / jnp.sqrt(bn_var + eps)).reshape(1, C2, 1, 1)
    y = y * scale + bias
    if act == "silu":
        y = y * jax.nn.sigmoid(y)
    return y


if __name__ == "__main__":
    # Module config: Conv2dAct(c1=4, c2=8, k=3, s=1) with default act=None.
    N, C1, H, W = 2, 4, 16, 16
    C2, K = 8, 3

    key = jax.random.PRNGKey(0)
    kx, kw_, kg, kb, km, kv = jax.random.split(key, 6)

    x = jax.random.normal(kx, (N, C1, H, W), dtype=jnp.float32)
    conv_w = jax.random.normal(kw_, (C2, C1, K, K), dtype=jnp.float32) * 0.1
    bn_gamma = 1.0 + 0.1 * jax.random.normal(kg, (C2,), dtype=jnp.float32)
    bn_beta = 0.1 * jax.random.normal(kb, (C2,), dtype=jnp.float32)
    bn_mean = 0.1 * jax.random.normal(km, (C2,), dtype=jnp.float32)
    bn_var = jnp.abs(1.0 + 0.1 * jax.random.normal(kv, (C2,), dtype=jnp.float32))

    # act=None (Identity) — matches module default
    out = conv2d_act(x, conv_w, bn_gamma, bn_beta, bn_mean, bn_var,
                     stride=1, dilation=1, act=None)
    out = jax.block_until_ready(out)
    ref = conv2d_act_ref(x, conv_w, bn_gamma, bn_beta, bn_mean, bn_var,
                         stride=1, dilation=1, act=None)
    assert out.shape == (N, C2, H, W), out.shape
    # bf16 MXU inputs with f32 accumulation -> looser tolerance than pure f32.
    assert jnp.allclose(out, ref, atol=3e-2, rtol=3e-2), \
        float(jnp.max(jnp.abs(out - ref)))

    # fused SiLU path
    out_s = conv2d_act(x, conv_w, bn_gamma, bn_beta, bn_mean, bn_var,
                       stride=1, dilation=1, act="silu")
    out_s = jax.block_until_ready(out_s)
    ref_s = conv2d_act_ref(x, conv_w, bn_gamma, bn_beta, bn_mean, bn_var,
                           stride=1, dilation=1, act="silu")
    assert jnp.allclose(out_s, ref_s, atol=3e-2, rtol=3e-2), \
        float(jnp.max(jnp.abs(out_s - ref_s)))

    print("KERNEL_OK")
</pallas_src>

<mosaic_0001>
module attributes {stable_mosaic.version = 11 : i64} {
  func.func @_gemm_bn_act_kernel(%arg0: i32, %arg1: i32, %arg2: i32, %arg3: memref<256x36xbf16, #tpu.memory_space<vmem>>, %arg4: memref<36x128xbf16, #tpu.memory_space<vmem>>, %arg5: memref<1x128xf32, #tpu.memory_space<vmem>>, %arg6: memref<256x128xf32, #tpu.memory_space<vmem>>, %arg7: memref<256x128xf32, #tpu.memory_space<vmem>>) attributes {dimension_semantics = [#tpu.dimension_semantics<parallel>, #tpu.dimension_semantics<parallel>, #tpu.dimension_semantics<arbitrary>], iteration_bounds = array<i64: 2, 1, 1>, scalar_prefetch = 0 : i64, scratch_operands = 1 : i64, tpu.core_type = #tpu.core_type<tc>, window_params = [{transform_indices = @transform_0, window_bounds = array<i64: 256, 36>}, {transform_indices = @transform_1, window_bounds = array<i64: 36, 128>}, {transform_indices = @transform_2, window_bounds = array<i64: 1, 128>}, {transform_indices = @transform_3, window_bounds = array<i64: 256, 128>}]} {
    %c0_i32 = arith.constant 0 : i32
    %0 = arith.cmpi eq, %arg2, %c0_i32 : i32
    %1 = arith.extui %0 : i1 to i32
    %c0_i32_0 = arith.constant 0 : i32
    %2 = arith.cmpi ne, %1, %c0_i32_0 : i32
    scf.if %2 {
      %cst_10 = arith.constant 0.000000e+00 : f32
      %12 = vector.broadcast %cst_10 : f32 to vector<256x128xf32>
      %c0_11 = arith.constant 0 : index
      %c0_12 = arith.constant 0 : index
      %13 = vector.load %arg7[%c0_11, %c0_12] : memref<256x128xf32, #tpu.memory_space<vmem>>, vector<256x128xf32>
      tpu.vector_store %arg7[%c0_11, %c0_12], %12 {strides = array<i32>} : memref<256x128xf32, #tpu.memory_space<vmem>>, vector<256x128xf32>,
    } else {
    }
    %c0 = arith.constant 0 : index
    %c0_1 = arith.constant 0 : index
    %3 = vector.load %arg7[%c0, %c0_1] : memref<256x128xf32, #tpu.memory_space<vmem>>, vector<256x128xf32>
    %c0_2 = arith.constant 0 : index
    %c0_3 = arith.constant 0 : index
    %4 = vector.load %arg3[%c0_2, %c0_3] : memref<256x36xbf16, #tpu.memory_space<vmem>>, vector<256x36xbf16>
    %c0_4 = arith.constant 0 : index
    %c0_5 = arith.constant 0 : index
    %5 = vector.load %arg4[%c0_4, %c0_5] : memref<36x128xbf16, #tpu.memory_space<vmem>>, vector<36x128xbf16>
    %cst = arith.constant dense<0.000000e+00> : vector<256x128xf32>
    %6 = tpu.matmul %4, %5, %cst {dimension_numbers = #tpu.dot_dimension_numbers<[1], [0], [0], [1], [0, 0, 1, 1], [], []>} : vector<256x36xbf16>, vector<36x128xbf16>, vector<256x128xf32> -> vector<256x128xf32>
    %7 = arith.addf %3, %6 : vector<256x128xf32>
    %c0_6 = arith.constant 0 : index
    %c0_7 = arith.constant 0 : index
    %8 = vector.load %arg7[%c0_6, %c0_7] : memref<256x128xf32, #tpu.memory_space<vmem>>, vector<256x128xf32>
    tpu.vector_store %arg7[%c0_6, %c0_7], %7 {strides = array<i32>} : memref<256x128xf32, #tpu.memory_space<vmem>>, vector<256x128xf32>,
    %c0_i32_8 = arith.constant 0 : i32
    %9 = arith.cmpi eq, %arg2, %c0_i32_8 : i32
    %10 = arith.extui %9 : i1 to i32
    %c0_i32_9 = arith.constant 0 : i32
    %11 = arith.cmpi ne, %10, %c0_i32_9 : i32
    scf.if %11 {
      %c0_10 = arith.constant 0 : index
      %c0_11 = arith.constant 0 : index
      %12 = vector.load %arg7[%c0_10, %c0_11] : memref<256x128xf32, #tpu.memory_space<vmem>>, vector<256x128xf32>
      %c0_12 = arith.constant 0 : index
      %c0_13 = arith.constant 0 : index
      %13 = vector.load %arg5[%c0_12, %c0_13] : memref<1x128xf32, #tpu.memory_space<vmem>>, vector<1x128xf32>
      %14 = vector.broadcast %13 : vector<1x128xf32> to vector<256x128xf32>
      %15 = arith.addf %12, %14 : vector<256x128xf32>
      %c0_14 = arith.constant 0 : index
      %c0_15 = arith.constant 0 : index
      %16 = vector.load %arg6[%c0_14, %c0_15] : memref<256x128xf32, #tpu.memory_space<vmem>>, vector<256x128xf32>
      tpu.vector_store %arg6[%c0_14, %c0_15], %15 {strides = array<i32>} : memref<256x128xf32, #tpu.memory_space<vmem>>, vector<256x128xf32>,
    } else {
    }
    return
  }
  func.func @transform_0(%arg0: i32, %arg1: i32, %arg2: i32) -> (i32, i32) {
    %c0_i32 = arith.constant 0 : i32
    return %arg0, %arg2 : i32, i32
  }
  func.func @transform_1(%arg0: i32, %arg1: i32, %arg2: i32) -> (i32, i32) {
    %c0_i32 = arith.constant 0 : i32
    return %arg2, %arg1 : i32, i32
  }
  func.func @transform_2(%arg0: i32, %arg1: i32, %arg2: i32) -> (i32, i32) {
    %c0_i32 = arith.constant 0 : i32
    %c0_i32_0 = arith.constant 0 : i32
    return %c0_i32, %arg1 : i32, i32
  }
  func.func @transform_3(%arg0: i32, %arg1: i32, %arg2: i32) -> (i32, i32) {
    %c0_i32 = arith.constant 0 : i32
    return %arg0, %arg1 : i32, i32
  }
}

</mosaic_0001>

<bundles_post_ra>
// kernel: tpu_custom_call.1
= control target key start
LH: loop header
LB: loop body
LE: loop exit
PB: predicated region body
PF: predicated region fallthrough
CT: control target
= control target key end

     0   :  { %8 = vsyncpa [#allocation4], 0  ;;  %s1392_s0 = inlined_call_operand.vmem [shape: bf16[512,36], index: 0, kind: input, shape index: {}]   ;;  %s1393_s1 = inlined_call_operand.vmem [shape: bf16[36,128], index: 1, kind: input, shape index: {}]   ;;  %s1394_s2 = inlined_call_operand.vmem [shape: f32[1,128], index: 2, kind: input, shape index: {}]   ;;  %s1395_s3 = inlined_call_operand.hbm [shape: f32[512,128], index: 3, kind: output, shape index: {}]  }
   0x1   :  { %10 = vsyncpa [#allocation4 + $0x1], 0  ;;  %s1177_s12 = smov 0   ;;  %s1179_s13 = smov 0  }
   0x2   :  { %s1181_s14 = smov 0   ;;  %s1183_s15 = smov 0  }
   0x3   :  { %s1185_s16 = smov 0   ;;  %s1187_s17 = smov 0  }
   0x4 LB: > { %s886_s18 = sadd.s32 4294967295, %s1153_s17   ;;  %s887_s19 = sadd.s32 4294967294, %s1153_s17   ;;  %s1153_s17 = sphi %s1187_s17, %s16_s17   ;;  %s1149_s16 = sphi %s1185_s16, %s1402_s16   ;;  %s1145_s15 = sphi %s1183_s15, %s1401_s15   ;;  %s1141_s14 = sphi %s1181_s14, %s1400_s14   ;;  %s1137_s13 = sphi %s1179_s13, %s1399_s13   ;;  %s1133_s12 = sphi %s1177_s12, %s1398_s12  }
   0x5   : > { %s35_s20 = sadd.s32 1, %s1149_s16  ;;  %s126_s21 = sadd.s32 1, %s1141_s14 }
   0x6   : > { %p37_p0 = scmp.ge.s32.totalorder %s35_s20, 2  ;;  %p136_p1 = scmp.ne.s32.totalorder %s1141_s14, %s1137_s13 }
   0x7   : > { %p137_p2 = scmp.eq.s32.totalorder %s886_s18, 1  ;;  %p142_p3 = scmp.ne.s32.totalorder %s1137_s13, %s1133_s12 }
   0x8   : > { %s1404_s20 = smov (%p37_p0, %s35_s20), 0  ;;  %p143_p5 = scmp.eq.s32.totalorder %s887_s19, 1 }
   0x9   : > { %p1217_p4 = por %p137_p2, %p136_p1  ;;  %s121_s23 = ssub.s32 %s1149_s16, %s1404_s20 }
   0xa   : > { %p892_p6 = scmp.ge.s32.totalorder %s1153_s17, 1  ;;  %p124_p7 = scmp.eq.s32.totalorder %s121_s23, 0 }
   0xb   : > { %p1224_p8 = por %p143_p5, %p142_p3  ;;  %p191_p9 = scmp.lt.s32.totalorder %s1153_s17, 3 }
   0xc   : > { %s1230_s25 = scalar_select %p124_p7, %s1141_s14, %s126_s21  }
   0xd   : > { %p192_p10 = pnand %p892_p6, %p191_p9 }
   0xe   : > { %s894_s28 = sshll.u32 (!%p192_p10), %s1145_s15, 5  ;;  %s226_s10 = sand.u32 (!%p192_p10), 1, %s1137_s13  }
   0xf   : > { %195 = sbr.rel (%p192_p10) target bundleno = 233 (0xe9), region = 32  ;;  %p230_p11 = scmp.lt.s32.totalorder (!%p192_p10), %s894_s28, 63 }
  0x10   : > { %s893_s11 = sshll.u32 (!%p192_p10), %s226_s10, 8  ;;  %s1007_s23 = sshll.u32 (!%p192_p10), %s1145_s15, 8 }
  0x11   : > { %s1289_s21 = scalar_lea.vmem (!%p192_p10), [#allocation3], %s893_s11  ;;  %s762_s30 = scalar_lea.sflag (!%p192_p10), [#allocation4], %s226_s10 }
  0x12   : > { %s775_s15 = sshll.u32 (!%p192_p10), %s1289_s21, 4  ;;  %s1095_s8 = scalar_lea.hbm (!%p192_p10), %s1395_s3, 512  ;;  %s776_s15 = int_to_ptr.vmem [resolvable:$true] %s775_s15 }
  0x14   : > { %v356_v0 = vld [vmem:[%s1393_s1 + $0x10] sm:$0x3]  ;;  %vm501_vm0 = vcmask 1041408   ;;  %s1406_s28 = smov (!%p230_p11, %s894_s28), 63  ;;  %v1006_v4 = vld [vmem:[%s1393_s1 + $0x8] sm:$0xff]  ;;  %v1005_v5 = vld [vmem:[%s1393_s1] sm:$0xff] }
  0x15   : > { %v446_v1 = vunpack.c.l.b16 %v356_v0  ;;  %s895_s4 = sshll.u32 %s1406_s28, 2  ;;  %vm452_vm1 = vcmask 293888   ;;  %v1285_v22 = vld [vmem:[%s1394_s2] ss:$0 sm:$0xff]  ;;  %s774_s28 = scalar_lea.hbm %s1395_s3, %s1007_s23 }
  0x16   : > { %s1245_s9 = scalar_lea.vmem %s1392_s0, %s895_s4  ;;  %s777_s29 = sshll.u32 %s774_s28, 4  ;;  %s778_s29 = int_to_ptr.hbm [resolvable:$true] %s777_s29 }
  0x17   : > { %v449_v2 = vpack.c.b16 %v446_v1, %v446_v1  ;;  %v989_v6 = vld [vmem:[%s1245_s9] sm:$0xff]  ;;  %v990_v10 = vld [vmem:[%s1245_s9 + $0x8] sm:$0xff]  ;;  %v991_v14 = vld [vmem:[%s1245_s9 + $0x10] sm:$0xff]  ;;  %s1089_s4 = sshra.s32 %s778_s29, 4  ;;  %s1090_s4 = int_to_ptr.hbm [resolvable:$true] %s1089_s4 }
  0x18   : > { %v993_v7 = vld [vmem:[%s1245_s9 + $0x20] sm:$0xff]  ;;  %v994_v11 = vld [vmem:[%s1245_s9 + $0x28] sm:$0xff]  ;;  %v995_v15 = vld [vmem:[%s1245_s9 + $0x30] sm:$0xff]  ;;  %s1091_s5 = scalar_lea.hbm %s1090_s4, 256  ;;  %p1096_p1 = scmp.lt.s32.totalorder %s1090_s4, %s1395_s3 }
  0x19   : > { %v503_v3 = vsel %vm501_vm0, %v449_v2, 0  ;;  %v997_v8 = vld [vmem:[%s1245_s9 + $0x40] sm:$0xff]  ;;  %v998_v12 = vld [vmem:[%s1245_s9 + $0x48] sm:$0xff]  ;;  %v999_v16 = vld [vmem:[%s1245_s9 + $0x50] sm:$0xff]  ;;  %p1092_p12 = scmp.ne.s32.totalorder %s1090_s4, %s1091_s5  ;;  %p1097_p2 = scmp.lt.s32.totalorder %s1095_s8, %s1091_s5 }
  0x1a   : > { %510 = vmatpush.bf16.msra.mxu0 %v503_v3  ;;  %1008 = vmatpush.bf16.msra.mxu1 %v503_v3  ;;  %v1001_v9 = vld [vmem:[%s1245_s9 + $0x60] sm:$0xff]  ;;  %v1002_v13 = vld [vmem:[%s1245_s9 + $0x68] sm:$0xff]  ;;  %v1003_v17 = vld [vmem:[%s1245_s9 + $0x70] sm:$0xff] }
  0x1b   : > { %1009 = vmatpush.bf16.msra.mxu2 %v503_v3  ;;  %1010 = vmatpush.bf16.msra.mxu3 %v503_v3  ;;  %v992_v18 = vld [vmem:[%s1245_s9 + $0x18] sm:$0xff]  ;;  %p1093_p13 = pnand %p1092_p12, %p1217_p4  ;;  %p1098_p3 = por %p1097_p2, %p1096_p1 }
  0x1c   : > { %v996_v19 = vld [vmem:[%s1245_s9 + $0x38] sm:$0xff] }
  0x1d   : > { %v1000_v20 = vld [vmem:[%s1245_s9 + $0x58] sm:$0xff]  ;;  %p1094_p0 = pneg %p1093_p13 }
  0x1e   : > { %511 = vmatpush.bf16.msra.mxu0 %v1006_v4  ;;  %1011 = vmatpush.bf16.msra.mxu1 %v1006_v4  ;;  %v1004_v21 = vld [vmem:[%s1245_s9 + $0x78] sm:$0xff] }
  0x1f   : > { %1012 = vmatpush.bf16.msra.mxu2 %v1006_v4  ;;  %1013 = vmatpush.bf16.msra.mxu3 %v1006_v4  ;;  %p1099_p5 = pnand %p1098_p3, %p1094_p0 }
  0x22   : > { %512 = vmatpush.bf16.msra.mxu0 %v1005_v5  ;;  %1014 = vmatpush.bf16.msra.mxu1 %v1005_v5 }
  0x23   : > { %1015 = vmatpush.bf16.msra.mxu2 %v1005_v5  ;;  %1016 = vmatpush.bf16.msra.mxu3 %v1005_v5 }
  0x25   : > { %968 = vmatmul.msk.bf16.vlgmr.msra.gmra.mxu0 %vm452_vm1, %v989_v6  ;;  %972 = vmatmul.msk.bf16.vlgmr.msra.gmra.mxu1 %vm452_vm1, %v993_v7 }
  0x26   : > { %976 = vmatmul.msk.bf16.vlgmr.msra.gmra.mxu2 %vm452_vm1, %v997_v8  ;;  %980 = vmatmul.msk.bf16.vlgmr.msra.gmra.mxu3 %vm452_vm1, %v1001_v9 }
  0x35   : > { %969 = vmatmul.msk.bf16.gmra.mxu0 %vm452_vm1, %v990_v10  ;;  %973 = vmatmul.msk.bf16.gmra.mxu1 %vm452_vm1, %v994_v11 }
  0x36   : > { %977 = vmatmul.msk.bf16.gmra.mxu2 %vm452_vm1, %v998_v12  ;;  %981 = vmatmul.msk.bf16.gmra.mxu3 %vm452_vm1, %v1002_v13 }
  0x45   : > { %970 = vmatmul.msk.bf16.gmra.mxu0 %vm452_vm1, %v991_v14  ;;  %974 = vmatmul.msk.bf16.gmra.mxu1 %vm452_vm1, %v995_v15 }
  0x46   : > { %978 = vmatmul.msk.bf16.gmra.mxu2 %vm452_vm1, %v999_v16  ;;  %982 = vmatmul.msk.bf16.gmra.mxu3 %vm452_vm1, %v1003_v17 }
  0x55   : > { %971 = vmatmul.msk.bf16.gmra.mxu0 %vm452_vm1, %v992_v18  ;;  %975 = vmatmul.msk.bf16.gmra.mxu1 %vm452_vm1, %v996_v19 }
  0x56   : > { %979 = vmatmul.msk.bf16.gmra.mxu2 %vm452_vm1, %v1000_v20  ;;  %983 = vmatmul.msk.bf16.gmra.mxu3 %vm452_vm1, %v1004_v21 }
  0xa2   : > { %v514_v23 = vpop.f32.mrf.mxu0  ;;  %v534_v24 = vpop.f32.mrf.mxu1 }
  0xa3   : > { %v697_v25 = vadd.f32 %v1285_v22, %v514_v23  ;;  %v705_v26 = vadd.f32 %v1285_v22, %v534_v24 }
  0xa5   : > { %729 = vst [vmem:[%s1289_s21] sm:$0xff] %v697_v25 }
  0xa6   : > { %737 = vst [vmem:[%s1289_s21 + $0x40] sm:$0xff] %v705_v26 }
  0xa9   : > { %v554_v27 = vpop.f32.mrf.mxu2  ;;  %v574_v28 = vpop.f32.mrf.mxu3 }
  0xaa   : > { %v713_v29 = vadd.f32 %v1285_v22, %v554_v27  ;;  %v721_v30 = vadd.f32 %v1285_v22, %v574_v28  ;;  %v516_v31 = vpop.f32.mrf.mxu0  ;;  %v536_v32 = vpop.f32.mrf.mxu1 }
  0xab   : > { %v698_v33 = vadd.f32 %v1285_v22, %v516_v31  ;;  %v706_v34 = vadd.f32 %v1285_v22, %v536_v32 }
  0xac   : > { %745 = vst [vmem:[%s1289_s21 + $0x80] sm:$0xff] %v713_v29 }
  0xad   : > { %753 = vst [vmem:[%s1289_s21 + $0xc0] sm:$0xff] %v721_v30 }
  0xae   : > { %730 = vst [vmem:[%s1289_s21 + $0x8] sm:$0xff] %v698_v33 }
  0xaf   : > { %738 = vst [vmem:[%s1289_s21 + $0x48] sm:$0xff] %v706_v34 }
  0xb1   : > { %v556_v35 = vpop.f32.mrf.mxu2  ;;  %v576_v36 = vpop.f32.mrf.mxu3 }
  0xb2   : > { %v714_v37 = vadd.f32 %v1285_v22, %v556_v35  ;;  %v722_v38 = vadd.f32 %v1285_v22, %v576_v36  ;;  %v519_v39 = vpop.f32.mrf.mxu0  ;;  %v539_v40 = vpop.f32.mrf.mxu1 }
  0xb3   : > { %v699_v41 = vadd.f32 %v1285_v22, %v519_v39  ;;  %v707_v42 = vadd.f32 %v1285_v22, %v539_v40 }
  0xb4   : > { %746 = vst [vmem:[%s1289_s21 + $0x88] sm:$0xff] %v714_v37 }
  0xb5   : > { %754 = vst [vmem:[%s1289_s21 + $0xc8] sm:$0xff] %v722_v38 }
  0xb6   : > { %731 = vst [vmem:[%s1289_s21 + $0x10] sm:$0xff] %v699_v41 }
  0xb7   : > { %739 = vst [vmem:[%s1289_s21 + $0x50] sm:$0xff] %v707_v42 }
  0xb9   : > { %v559_v43 = vpop.f32.mrf.mxu2  ;;  %v579_v44 = vpop.f32.mrf.mxu3 }
  0xba   : > { %v715_v45 = vadd.f32 %v1285_v22, %v559_v43  ;;  %v723_v46 = vadd.f32 %v1285_v22, %v579_v44  ;;  %v521_v47 = vpop.f32.mrf.mxu0  ;;  %v541_v48 = vpop.f32.mrf.mxu1 }
  0xbb   : > { %v700_v49 = vadd.f32 %v1285_v22, %v521_v47  ;;  %v708_v50 = vadd.f32 %v1285_v22, %v541_v48 }
  0xbc   : > { %747 = vst [vmem:[%s1289_s21 + $0x90] sm:$0xff] %v715_v45 }
  0xbd   : > { %755 = vst [vmem:[%s1289_s21 + $0xd0] sm:$0xff] %v723_v46 }
  0xbe   : > { %732 = vst [vmem:[%s1289_s21 + $0x18] sm:$0xff] %v700_v49 }
  0xbf   : > { %740 = vst [vmem:[%s1289_s21 + $0x58] sm:$0xff] %v708_v50 }
  0xc1   : > { %v561_v51 = vpop.f32.mrf.mxu2  ;;  %v581_v52 = vpop.f32.mrf.mxu3 }
  0xc2   : > { %v716_v53 = vadd.f32 %v1285_v22, %v561_v51  ;;  %v724_v54 = vadd.f32 %v1285_v22, %v581_v52  ;;  %v524_v55 = vpop.f32.mrf.mxu0  ;;  %v544_v56 = vpop.f32.mrf.mxu1 }
  0xc3   : > { %v701_v57 = vadd.f32 %v1285_v22, %v524_v55  ;;  %v709_v58 = vadd.f32 %v1285_v22, %v544_v56 }
  0xc4   : > { %748 = vst [vmem:[%s1289_s21 + $0x98] sm:$0xff] %v716_v53 }
  0xc5   : > { %756 = vst [vmem:[%s1289_s21 + $0xd8] sm:$0xff] %v724_v54 }
  0xc6   : > { %733 = vst [vmem:[%s1289_s21 + $0x20] sm:$0xff] %v701_v57 }
  0xc7   : > { %741 = vst [vmem:[%s1289_s21 + $0x60] sm:$0xff] %v709_v58 }
  0xc9   : > { %v564_v59 = vpop.f32.mrf.mxu2  ;;  %v584_v60 = vpop.f32.mrf.mxu3 }
  0xca   : > { %v717_v61 = vadd.f32 %v1285_v22, %v564_v59  ;;  %v725_v62 = vadd.f32 %v1285_v22, %v584_v60  ;;  %v526_v63 = vpop.f32.mrf.mxu0  ;;  %v546_v0 = vpop.f32.mrf.mxu1 }
  0xcb   : > { %v702_v1 = vadd.f32 %v1285_v22, %v526_v63  ;;  %v710_v2 = vadd.f32 %v1285_v22, %v546_v0 }
  0xcc   : > { %749 = vst [vmem:[%s1289_s21 + $0xa0] sm:$0xff] %v717_v61 }
  0xcd   : > { %757 = vst [vmem:[%s1289_s21 + $0xe0] sm:$0xff] %v725_v62 }
  0xce   : > { %734 = vst [vmem:[%s1289_s21 + $0x28] sm:$0xff] %v702_v1 }
  0xcf   : > { %742 = vst [vmem:[%s1289_s21 + $0x68] sm:$0xff] %v710_v2 }
  0xd1   : > { %v566_v3 = vpop.f32.mrf.mxu2  ;;  %v586_v4 = vpop.f32.mrf.mxu3 }
  0xd2   : > { %v718_v5 = vadd.f32 %v1285_v22, %v566_v3  ;;  %v726_v6 = vadd.f32 %v1285_v22, %v586_v4  ;;  %v529_v7 = vpop.f32.mrf.mxu0  ;;  %v549_v8 = vpop.f32.mrf.mxu1 }
  0xd3   : > { %v703_v9 = vadd.f32 %v1285_v22, %v529_v7  ;;  %v711_v10 = vadd.f32 %v1285_v22, %v549_v8 }
  0xd4   : > { %750 = vst [vmem:[%s1289_s21 + $0xa8] sm:$0xff] %v718_v5 }
  0xd5   : > { %758 = vst [vmem:[%s1289_s21 + $0xe8] sm:$0xff] %v726_v6 }
  0xd6   : > { %735 = vst [vmem:[%s1289_s21 + $0x30] sm:$0xff] %v703_v9 }
  0xd7   : > { %743 = vst [vmem:[%s1289_s21 + $0x70] sm:$0xff] %v711_v10 }
  0xd9   : > { %v569_v11 = vpop.f32.mrf.mxu2  ;;  %v589_v12 = vpop.f32.mrf.mxu3 }
  0xda   : > { %v719_v13 = vadd.f32 %v1285_v22, %v569_v11  ;;  %v727_v14 = vadd.f32 %v1285_v22, %v589_v12  ;;  %v531_v15 = vpop.f32.mrf.mxu0  ;;  %v551_v16 = vpop.f32.mrf.mxu1 }
  0xdb   : > { %v704_v17 = vadd.f32 %v1285_v22, %v531_v15  ;;  %v712_v18 = vadd.f32 %v1285_v22, %v551_v16 }
  0xdc   : > { %751 = vst [vmem:[%s1289_s21 + $0xb0] sm:$0xff] %v719_v13 }
  0xdd   : > { %759 = vst [vmem:[%s1289_s21 + $0xf0] sm:$0xff] %v727_v14 }
  0xde   : > { %736 = vst [vmem:[%s1289_s21 + $0x38] sm:$0xff] %v704_v17 }
  0xdf   : > { %744 = vst [vmem:[%s1289_s21 + $0x78] sm:$0xff] %v712_v18 }
  0xe1   : > { %v571_v19 = vpop.f32.mrf.mxu2  ;;  %v591_v20 = vpop.f32.mrf.mxu3 }
  0xe2   : > { %v720_v21 = vadd.f32 %v1285_v22, %v571_v19  ;;  %v728_v23 = vadd.f32 %v1285_v22, %v591_v20 }
  0xe4   : > { %752 = vst [vmem:[%s1289_s21 + $0xb8] sm:$0xff] %v720_v21 }
  0xe5   : > { %760 = vst [vmem:[%s1289_s21 + $0xf8] sm:$0xff] %v728_v23 }
  0xe6   : > { %1102 = shalt.err (!%p1099_p5)
}
  0xe7   : > { %s1155_s10 = smov 128   ;;  %s1156_s18 = smov 8  }
  0xe8   : > { %1017 = dma.vmem_to_hbm [thread:$0]  (%p1217_p4), %s776_s15, 4096, %s778_s29, %s762_s30, %s1155_s10, %s1155_s10, %s1156_s18  }
  0xe9 PF: > { %p1023_p6 = scmp.ge.s32.totalorder %s1153_s17, 2  ;;  %s792_s19 = sand.u32 1, %s1133_s12  }
  0xea   : > { %s793_s21 = scalar_lea.sflag [#allocation4], %s792_s19 }
  0xeb   : > { %p1020_p7 = pnand %p1023_p6, %p1224_p8 }
  0xed   : > { %p1021_p9 = pneg %p1020_p7 }
  0xef   : > { %1128 = dma.done.wait (%p1021_p9), %s793_s21, 4096  }
  0xf0   : > { %1130 = vsyncadd (%p1021_p9), %s793_s21, 4294963200  ;;  %s16_s17 = sadd.s32 1, %s1153_s17   ;;  %s1398_s12 = smov %s1137_s13 }
  0xf1   : > { %p13_p10 = scmp.ge.s32.totalorder %s16_s17, 4   ;;  %s1399_s13 = smov %s1141_s14 }
  0xf2   : > { %s1400_s14 = smov %s1230_s25  ;;  %s1401_s15 = smov %s1149_s16 }
  0xf3   : > { %s1402_s16 = smov %s1404_s20  ;;  %15 = sbr.rel (!%p13_p10) target bundleno = 4 (0x4), region = 81 }
  0xf8   :  { %799 = vsyncpa [#allocation4], 1 }
  0xf9   :  { %801 = vsyncpa [#allocation4 + $0x1], 1 }

</bundles_post_ra>
